<compile_context>
chip_gen: v5e
topology: v5e:2x2
jax: 0.10.0
libtpu: 0.0.40
codegen_flags: <defaults>
</compile_context>

<pallas_src>
import functools

import jax
import jax.numpy as jnp
import numpy as np
from jax.experimental import pallas as pl
from jax.experimental.pallas import tpu as pltpu

_LN2 = float(np.log(2.0))


def _iaf_flow_kernel(num_layers, d_real, d_pad,
                     x_ref, w1_ref, b1_ref, wms_ref, bms_ref,
                     out_ref, logdet_ref, xpad_ref):
    """All IAF layers for one batch tile.

    x_ref:     (TB, D)           raw input tile (un-padded)
    w1_ref:    (L, Dp, Dp)       masked+transposed (and R-folded) auto_nn weights
    b1_ref:    (L, 1, Dp)        auto_nn biases
    wms_ref:   (L, Dp, 2*Dp)     fused [m_net | s_net] weights (R-folded)
    bms_ref:   (L, 1, 2*Dp)      fused [m_net | s_net] biases
    out_ref:   (TB, D)           transformed z (still in the folded basis)
    logdet_ref:(TB, 1)           accumulated log-determinant
    xpad_ref:  (TB, Dp)          VMEM staging buffer (zero-padded, lane-dense)
    """
    # Stage the (TB, D) tile into a zeroed lane-dense (TB, 128) buffer.  Zero the
    # whole buffer every step (cheap) so megacore sharding of the batch grid can
    # never expose stale padded lanes.
    xpad_ref[...] = jnp.zeros_like(xpad_ref)
    xpad_ref[:, :d_real] = x_ref[...]
    y = xpad_ref[...]

    logdet = jnp.zeros(logdet_ref.shape, jnp.float32)

    for l in range(num_layers):  # small static unroll (L = 3)
        # auto_nn: MaskedLinear + ReLU
        h = jnp.dot(y, w1_ref[l], preferred_element_type=jnp.float32) + b1_ref[l]
        h = jnp.maximum(h, 0.0)
        # fused m_net / s_net projection: one (TB, Dp) x (Dp, 2*Dp) matmul
        ms = jnp.dot(h, wms_ref[l], preferred_element_type=jnp.float32) + bms_ref[l]
        m = ms[:, :d_pad]
        s = ms[:, d_pad:]

        # Shared-exponential sigmoid / log-sigmoid (2 transcendentals per element):
        #   e = exp(-|s|);  sigmoid(s) = where(s>=0, 1, e) / (1+e)
        #   log(sigmoid(s)) = min(s, 0) - log(1+e)
        e = jnp.exp(-jnp.abs(s))
        denom = 1.0 + e
        sig = jnp.where(s >= 0.0, 1.0, e) / denom
        log_sig = jnp.minimum(s, 0.0) - jnp.log(denom)

        y = sig * y + (1.0 - sig) * m
        logdet = logdet + jnp.sum(log_sig, axis=1, keepdims=True)
        # (no permutation here: it was folded into the packed weights)

    # Padded lanes have s == 0 in every layer -> each contributed exactly -ln(2)
    # to the all-lane sum above; correct with one compile-time scalar.
    logdet = logdet + jnp.float32(num_layers * (d_pad - d_real) * _LN2)

    out_ref[...] = y[:, :d_real].astype(out_ref.dtype)
    logdet_ref[...] = logdet


def _choose_block_b(batch):
    """MXU-friendly batch tile; >= 2 grid steps when possible (v7x megacore)."""
    if batch >= 512:
        return 256
    if batch <= 8:
        return batch
    half = -(-batch // 2)                 # ceil(batch / 2)
    return max(8, ((half + 7) // 8) * 8)  # row count multiple of 8


def iaf_flow_pallas(x, w1, b1, wms, bms, *, num_layers, block_b=None):
    B, D = x.shape
    L, Dp, _ = w1.shape
    TB = _choose_block_b(B) if block_b is None else block_b
    grid = (pl.cdiv(B, TB),)   # partial last tile is fine: rows are independent,
                               # OOB output rows are masked on writeback.

    kernel = functools.partial(_iaf_flow_kernel, num_layers, D, Dp)
    out, logdet = pl.pallas_call(
        kernel,
        out_shape=(
            jax.ShapeDtypeStruct((B, D), jnp.float32),
            jax.ShapeDtypeStruct((B, 1), jnp.float32),
        ),
        grid=grid,
        in_specs=[
            pl.BlockSpec((TB, D), lambda i: (i, 0)),              # raw x tile
            pl.BlockSpec((L, Dp, Dp), lambda i: (0, 0, 0)),       # weights stay resident
            pl.BlockSpec((L, 1, Dp), lambda i: (0, 0, 0)),
            pl.BlockSpec((L, Dp, 2 * Dp), lambda i: (0, 0, 0)),
            pl.BlockSpec((L, 1, 2 * Dp), lambda i: (0, 0, 0)),
        ],
        out_specs=(
            pl.BlockSpec((TB, D), lambda i: (i, 0)),
            pl.BlockSpec((TB, 1), lambda i: (i, 0)),
        ),
        scratch_shapes=[pltpu.VMEM((TB, Dp), jnp.float32)],       # zero-pad staging
        compiler_params=pltpu.CompilerParams(
            dimension_semantics=("parallel",)),
    )(x, w1, b1, wms, bms)
    return out, logdet


@functools.partial(jax.jit, static_argnames=("num_layers", "flip_output", "block_b"))
def iaf_flow_forward(x, w1, b1, wms, bms, *, num_layers, flip_output, block_b=None):
    """Jitted forward: Pallas kernel + (tiny) residual R^L flip when L is odd."""
    out, logdet = iaf_flow_pallas(x, w1, b1, wms, bms,
                                  num_layers=num_layers, block_b=block_b)
    if flip_output:
        # Residual R^L (L odd).  Kept outside the kernel: it is a (B, D) lane
        # reversal, negligible next to the HBM traffic already saved.
        out = out[:, ::-1]
    return out, logdet[:, 0]


def pack_params(raw_params, D, Dp=128):
    """Mask, transpose, fold the reverse permutation, fuse m/s, and pad to 128 lanes.

    Call ONCE per parameter set; the returned stacks are device-resident arrays.
    """
    assert D <= Dp
    L = len(raw_params)
    mask = np.triu(np.ones((D, D), np.float32), k=1)  # strictly upper triangular
    w1_stack = np.zeros((L, Dp, Dp), np.float32)
    b1_stack = np.zeros((L, 1, Dp), np.float32)
    wms_stack = np.zeros((L, Dp, 2 * Dp), np.float32)
    bms_stack = np.zeros((L, 1, 2 * Dp), np.float32)

    for l, (W1, b1, Wm, bm, Ws, bs) in enumerate(raw_params):
        W1t = (np.asarray(W1) * mask).T   # y = z @ W1t + b1
        Wmt = (np.asarray(Wm) * mask).T
        Wst = (np.asarray(Ws) * mask).T
        b1v = np.asarray(b1)
        bmv = np.asarray(bm)
        bsv = np.asarray(bs)
        if l % 2 == 1:
            # Fold the accumulated reverse permutation R^l (= R for odd l, R^2 = I):
            #   input side:  W1t' = R @ W1t   -> flip rows
            #   output side: Wt'  = Wt @ R    -> flip columns (and biases)
            W1t = W1t[::-1, :]
            Wmt = Wmt[:, ::-1]
            Wst = Wst[:, ::-1]
            bmv = bmv[::-1]
            bsv = bsv[::-1]
        w1_stack[l, :D, :D] = W1t
        b1_stack[l, 0, :D] = b1v
        wms_stack[l, :D, :D] = Wmt              # m half
        wms_stack[l, :D, Dp:Dp + D] = Wst       # s half
        bms_stack[l, 0, :D] = bmv
        bms_stack[l, 0, Dp:Dp + D] = bsv

    return (jnp.asarray(w1_stack), jnp.asarray(b1_stack),
            jnp.asarray(wms_stack), jnp.asarray(bms_stack))


def ref_forward(x, raw_params, R, mask):
    """Pure-JAX reference mirroring the PyTorch IAF_FLOW forward."""
    z = x
    logdet_sum = jnp.zeros((x.shape[0],), jnp.float32)
    for (W1, b1, Wm, bm, Ws, bs) in raw_params:
        h = jax.nn.relu(z @ (W1 * mask).T + b1)
        m = h @ (Wm * mask).T + bm
        s = h @ (Ws * mask).T + bs
        sigma = jax.nn.sigmoid(s)
        z = sigma * z + (1.0 - sigma) * m
        logdet_sum = logdet_sum + jnp.log(sigma).sum(axis=1)
        z = z @ R
    return z, logdet_sum


def init_params(key, dim, num_layers):
    """Deterministic init matching nn.Linear's default U(-1/sqrt(dim), 1/sqrt(dim))."""
    bound = 1.0 / np.sqrt(dim)
    raw_params = []
    for _ in range(num_layers):
        layer = []
        for _ in range(3):  # auto_nn linear, m_net, s_net
            key, kw, kb = jax.random.split(key, 3)
            W = jax.random.uniform(kw, (dim, dim), jnp.float32, -bound, bound)
            b = jax.random.uniform(kb, (dim,), jnp.float32, -bound, bound)
            layer.extend([W, b])
        raw_params.append(tuple(layer))
    return raw_params


if __name__ == "__main__":
    B, D, L = 8, 32, 3

    key = jax.random.PRNGKey(0)
    key, kx, kp = jax.random.split(key, 3)
    x = jax.random.normal(kx, (B, D), jnp.float32)
    raw_params = init_params(kp, D, L)

    # Pack weights ONCE (mask, transpose, fold R, fuse m/s, pad to 128 lanes).
    w1, b1, wms, bms = pack_params(raw_params, D, Dp=128)

    out, logdet = iaf_flow_forward(x, w1, b1, wms, bms,
                                   num_layers=L, flip_output=(L % 2 == 1))
    out = jax.block_until_ready(out)
    logdet = jax.block_until_ready(logdet)

    # Validate against the pure-JAX reference (original, unfolded formulation).
    mask = jnp.triu(jnp.ones((D, D), jnp.float32), k=1)
    R = jnp.asarray(np.flip(np.eye(D), axis=1).copy(), jnp.float32)
    out_ref, logdet_ref = ref_forward(x, raw_params, R, mask)
    assert out.shape == (B, D) and logdet.shape == (B,)
    np.testing.assert_allclose(np.asarray(out), np.asarray(out_ref), rtol=1e-5, atol=1e-5)
    np.testing.assert_allclose(np.asarray(logdet), np.asarray(logdet_ref), rtol=1e-5, atol=1e-5)

    print("KERNEL_OK")
</pallas_src>

<mosaic_0001>
module attributes {stable_mosaic.version = 11 : i64} {
  func.func @_iaf_flow_kernel(%arg0: i32, %arg1: memref<8x32xf32, #tpu.memory_space<vmem>>, %arg2: memref<3x128x128xf32, #tpu.memory_space<vmem>>, %arg3: memref<3x1x128xf32, #tpu.memory_space<vmem>>, %arg4: memref<3x128x256xf32, #tpu.memory_space<vmem>>, %arg5: memref<3x1x256xf32, #tpu.memory_space<vmem>>, %arg6: memref<8x32xf32, #tpu.memory_space<vmem>>, %arg7: memref<8x1xf32, #tpu.memory_space<vmem>>, %arg8: memref<8x128xf32, #tpu.memory_space<vmem>>) attributes {dimension_semantics = [#tpu.dimension_semantics<parallel>], iteration_bounds = array<i64: 1>, scalar_prefetch = 0 : i64, scratch_operands = 1 : i64, tpu.core_type = #tpu.core_type<tc>, window_params = [{transform_indices = @transform_0, window_bounds = array<i64: 8, 32>}, {pipeline_mode = #tpu.pipeline_mode<synchronous>, transform_indices = @transform_1, window_bounds = array<i64: 3, 128, 128>}, {pipeline_mode = #tpu.pipeline_mode<synchronous>, transform_indices = @transform_2, window_bounds = array<i64: 3, 1, 128>}, {pipeline_mode = #tpu.pipeline_mode<synchronous>, transform_indices = @transform_3, window_bounds = array<i64: 3, 128, 256>}, {pipeline_mode = #tpu.pipeline_mode<synchronous>, transform_indices = @transform_4, window_bounds = array<i64: 3, 1, 256>}, {transform_indices = @transform_5, window_bounds = array<i64: 8, 32>}, {transform_indices = @transform_6, window_bounds = array<i64: 8, 1>}]} {
    %cst = arith.constant 0.000000e+00 : f32
    %0 = vector.broadcast %cst : f32 to vector<8x128xf32>
    %c0 = arith.constant 0 : index
    %c0_0 = arith.constant 0 : index
    %1 = vector.load %arg8[%c0, %c0_0] : memref<8x128xf32, #tpu.memory_space<vmem>>, vector<8x128xf32>
    tpu.vector_store %arg8[%c0, %c0_0], %0 {strides = array<i32>} : memref<8x128xf32, #tpu.memory_space<vmem>>, vector<8x128xf32>,
    %c0_1 = arith.constant 0 : index
    %c0_2 = arith.constant 0 : index
    %2 = vector.load %arg1[%c0_1, %c0_2] : memref<8x32xf32, #tpu.memory_space<vmem>>, vector<8x32xf32>
    %c0_3 = arith.constant 0 : index
    %c0_4 = arith.constant 0 : index
    %3 = vector.load %arg8[%c0_3, %c0_4] : memref<8x128xf32, #tpu.memory_space<vmem>>, vector<8x32xf32>
    tpu.vector_store %arg8[%c0_3, %c0_4], %2 {strides = array<i32>} : memref<8x128xf32, #tpu.memory_space<vmem>>, vector<8x32xf32>,
    %c0_5 = arith.constant 0 : index
    %c0_6 = arith.constant 0 : index
    %4 = vector.load %arg8[%c0_5, %c0_6] : memref<8x128xf32, #tpu.memory_space<vmem>>, vector<8x128xf32>
    %cst_7 = arith.constant 0.000000e+00 : f32
    %5 = vector.broadcast %cst_7 : f32 to vector<8x1xf32>
    %c0_8 = arith.constant 0 : index
    %c0_9 = arith.constant 0 : index
    %c0_10 = arith.constant 0 : index
    %6 = vector.load %arg2[%c0_8, %c0_9, %c0_10] : memref<3x128x128xf32, #tpu.memory_space<vmem>>, vector<1x128x128xf32>
    %7 = vector.shape_cast %6 : vector<1x128x128xf32> to vector<128x128xf32>
    %cst_11 = arith.constant dense<0.000000e+00> : vector<8x128xf32>
    %8 = tpu.matmul %4, %7, %cst_11 {dimension_numbers = #tpu.dot_dimension_numbers<[1], [0], [0], [1], [0, 0, 1, 1], [], []>} : vector<8x128xf32>, vector<128x128xf32>, vector<8x128xf32> -> vector<8x128xf32>
    %c0_12 = arith.constant 0 : index
    %c0_13 = arith.constant 0 : index
    %c0_14 = arith.constant 0 : index
    %9 = vector.load %arg3[%c0_12, %c0_13, %c0_14] : memref<3x1x128xf32, #tpu.memory_space<vmem>>, vector<1x1x128xf32>
    %10 = vector.shape_cast %9 : vector<1x1x128xf32> to vector<1x128xf32>
    %11 = vector.broadcast %10 : vector<1x128xf32> to vector<8x128xf32>
    %12 = arith.addf %8, %11 : vector<8x128xf32>
    %cst_15 = arith.constant 0.000000e+00 : f32
    %13 = vector.broadcast %cst_15 : f32 to vector<8x128xf32>
    %14 = arith.maximumf %12, %13 : vector<8x128xf32>
    %c0_16 = arith.constant 0 : index
    %c0_17 = arith.constant 0 : index
    %c0_18 = arith.constant 0 : index
    %15 = vector.load %arg4[%c0_16, %c0_17, %c0_18] : memref<3x128x256xf32, #tpu.memory_space<vmem>>, vector<1x128x256xf32>
    %16 = vector.shape_cast %15 : vector<1x128x256xf32> to vector<128x256xf32>
    %cst_19 = arith.constant dense<0.000000e+00> : vector<8x256xf32>
    %17 = tpu.matmul %14, %16, %cst_19 {dimension_numbers = #tpu.dot_dimension_numbers<[1], [0], [0], [1], [0, 0, 1, 1], [], []>} : vector<8x128xf32>, vector<128x256xf32>, vector<8x256xf32> -> vector<8x256xf32>
    %c0_20 = arith.constant 0 : index
    %c0_21 = arith.constant 0 : index
    %c0_22 = arith.constant 0 : index
    %18 = vector.load %arg5[%c0_20, %c0_21, %c0_22] : memref<3x1x256xf32, #tpu.memory_space<vmem>>, vector<1x1x256xf32>
    %19 = vector.shape_cast %18 : vector<1x1x256xf32> to vector<1x256xf32>
    %20 = vector.broadcast %19 : vector<1x256xf32> to vector<8x256xf32>
    %21 = arith.addf %17, %20 : vector<8x256xf32>
    %22 = vector.extract_strided_slice %21 {offsets = [0, 0], sizes = [8, 128], strides = [1, 1]} : vector<8x256xf32> to vector<8x128xf32>
    %23 = vector.extract_strided_slice %21 {offsets = [0, 128], sizes = [8, 128], strides = [1, 1]} : vector<8x256xf32> to vector<8x128xf32>
    %24 = math.absf %23 : vector<8x128xf32>
    %cst_23 = arith.constant 0.000000e+00 : f32
    %25 = vector.broadcast %cst_23 : f32 to vector<8x128xf32>
    %26 = arith.subf %25, %24 : vector<8x128xf32>
    %27 = math.exp %26 : vector<8x128xf32>
    %cst_24 = arith.constant 1.000000e+00 : f32
    %28 = vector.broadcast %cst_24 : f32 to vector<8x128xf32>
    %29 = arith.addf %28, %27 : vector<8x128xf32>
    %cst_25 = arith.constant 0.000000e+00 : f32
    %30 = vector.broadcast %cst_25 : f32 to vector<8x128xf32>
    %31 = arith.cmpf oge, %23, %30 : vector<8x128xf32>
    %cst_26 = arith.constant 1.000000e+00 : f32
    %32 = vector.broadcast %cst_26 : f32 to vector<8x128xf32>
    %33 = arith.select %31, %32, %27 : vector<8x128xi1>, vector<8x128xf32>
    %34 = arith.divf %33, %29 : vector<8x128xf32>
    %cst_27 = arith.constant 0.000000e+00 : f32
    %35 = vector.broadcast %cst_27 : f32 to vector<8x128xf32>
    %36 = arith.minimumf %23, %35 : vector<8x128xf32>
    %37 = math.log %29 : vector<8x128xf32>
    %38 = arith.subf %36, %37 : vector<8x128xf32>
    %39 = arith.mulf %34, %4 : vector<8x128xf32>
    %cst_28 = arith.constant 1.000000e+00 : f32
    %40 = vector.broadcast %cst_28 : f32 to vector<8x128xf32>
    %41 = arith.subf %40, %34 : vector<8x128xf32>
    %42 = arith.mulf %41, %22 : vector<8x128xf32>
    %43 = arith.addf %39, %42 : vector<8x128xf32>
    %cst_29 = arith.constant dense<0.000000e+00> : vector<8xf32>
    %44 = vector.multi_reduction <add>, %38, %cst_29 [1] : vector<8x128xf32> to vector<8xf32>
    %45 = vector.shape_cast %44 : vector<8xf32> to vector<8x1xf32>
    %46 = arith.addf %5, %45 : vector<8x1xf32>
    %c1 = arith.constant 1 : index
    %c0_30 = arith.constant 0 : index
    %c0_31 = arith.constant 0 : index
    %47 = vector.load %arg2[%c1, %c0_30, %c0_31] : memref<3x128x128xf32, #tpu.memory_space<vmem>>, vector<1x128x128xf32>
    %48 = vector.shape_cast %47 : vector<1x128x128xf32> to vector<128x128xf32>
    %cst_32 = arith.constant dense<0.000000e+00> : vector<8x128xf32>
    %49 = tpu.matmul %43, %48, %cst_32 {dimension_numbers = #tpu.dot_dimension_numbers<[1], [0], [0], [1], [0, 0, 1, 1], [], []>} : vector<8x128xf32>, vector<128x128xf32>, vector<8x128xf32> -> vector<8x128xf32>
    %c1_33 = arith.constant 1 : index
    %c0_34 = arith.constant 0 : index
    %c0_35 = arith.constant 0 : index
    %50 = vector.load %arg3[%c1_33, %c0_34, %c0_35] : memref<3x1x128xf32, #tpu.memory_space<vmem>>, vector<1x1x128xf32>
    %51 = vector.shape_cast %50 : vector<1x1x128xf32> to vector<1x128xf32>
    %52 = vector.broadcast %51 : vector<1x128xf32> to vector<8x128xf32>
    %53 = arith.addf %49, %52 : vector<8x128xf32>
    %cst_36 = arith.constant 0.000000e+00 : f32
    %54 = vector.broadcast %cst_36 : f32 to vector<8x128xf32>
    %55 = arith.maximumf %53, %54 : vector<8x128xf32>
    %c1_37 = arith.constant 1 : index
    %c0_38 = arith.constant 0 : index
    %c0_39 = arith.constant 0 : index
    %56 = vector.load %arg4[%c1_37, %c0_38, %c0_39] : memref<3x128x256xf32, #tpu.memory_space<vmem>>, vector<1x128x256xf32>
    %57 = vector.shape_cast %56 : vector<1x128x256xf32> to vector<128x256xf32>
    %cst_40 = arith.constant dense<0.000000e+00> : vector<8x256xf32>
    %58 = tpu.matmul %55, %57, %cst_40 {dimension_numbers = #tpu.dot_dimension_numbers<[1], [0], [0], [1], [0, 0, 1, 1], [], []>} : vector<8x128xf32>, vector<128x256xf32>, vector<8x256xf32> -> vector<8x256xf32>
    %c1_41 = arith.constant 1 : index
    %c0_42 = arith.constant 0 : index
    %c0_43 = arith.constant 0 : index
    %59 = vector.load %arg5[%c1_41, %c0_42, %c0_43] : memref<3x1x256xf32, #tpu.memory_space<vmem>>, vector<1x1x256xf32>
    %60 = vector.shape_cast %59 : vector<1x1x256xf32> to vector<1x256xf32>
    %61 = vector.broadcast %60 : vector<1x256xf32> to vector<8x256xf32>
    %62 = arith.addf %58, %61 : vector<8x256xf32>
    %63 = vector.extract_strided_slice %62 {offsets = [0, 0], sizes = [8, 128], strides = [1, 1]} : vector<8x256xf32> to vector<8x128xf32>
    %64 = vector.extract_strided_slice %62 {offsets = [0, 128], sizes = [8, 128], strides = [1, 1]} : vector<8x256xf32> to vector<8x128xf32>
    %65 = math.absf %64 : vector<8x128xf32>
    %cst_44 = arith.constant 0.000000e+00 : f32
    %66 = vector.broadcast %cst_44 : f32 to vector<8x128xf32>
    %67 = arith.subf %66, %65 : vector<8x128xf32>
    %68 = math.exp %67 : vector<8x128xf32>
    %cst_45 = arith.constant 1.000000e+00 : f32
    %69 = vector.broadcast %cst_45 : f32 to vector<8x128xf32>
    %70 = arith.addf %69, %68 : vector<8x128xf32>
    %cst_46 = arith.constant 0.000000e+00 : f32
    %71 = vector.broadcast %cst_46 : f32 to vector<8x128xf32>
    %72 = arith.cmpf oge, %64, %71 : vector<8x128xf32>
    %cst_47 = arith.constant 1.000000e+00 : f32
    %73 = vector.broadcast %cst_47 : f32 to vector<8x128xf32>
    %74 = arith.select %72, %73, %68 : vector<8x128xi1>, vector<8x128xf32>
    %75 = arith.divf %74, %70 : vector<8x128xf32>
    %cst_48 = arith.constant 0.000000e+00 : f32
    %76 = vector.broadcast %cst_48 : f32 to vector<8x128xf32>
    %77 = arith.minimumf %64, %76 : vector<8x128xf32>
    %78 = math.log %70 : vector<8x128xf32>
    %79 = arith.subf %77, %78 : vector<8x128xf32>
    %80 = arith.mulf %75, %43 : vector<8x128xf32>
    %cst_49 = arith.constant 1.000000e+00 : f32
    %81 = vector.broadcast %cst_49 : f32 to vector<8x128xf32>
    %82 = arith.subf %81, %75 : vector<8x128xf32>
    %83 = arith.mulf %82, %63 : vector<8x128xf32>
    %84 = arith.addf %80, %83 : vector<8x128xf32>
    %cst_50 = arith.constant dense<0.000000e+00> : vector<8xf32>
    %85 = vector.multi_reduction <add>, %79, %cst_50 [1] : vector<8x128xf32> to vector<8xf32>
    %86 = vector.shape_cast %85 : vector<8xf32> to vector<8x1xf32>
    %87 = arith.addf %46, %86 : vector<8x1xf32>
    %c2 = arith.constant 2 : index
    %c0_51 = arith.constant 0 : index
    %c0_52 = arith.constant 0 : index
    %88 = vector.load %arg2[%c2, %c0_51, %c0_52] : memref<3x128x128xf32, #tpu.memory_space<vmem>>, vector<1x128x128xf32>
    %89 = vector.shape_cast %88 : vector<1x128x128xf32> to vector<128x128xf32>
    %cst_53 = arith.constant dense<0.000000e+00> : vector<8x128xf32>
    %90 = tpu.matmul %84, %89, %cst_53 {dimension_numbers = #tpu.dot_dimension_numbers<[1], [0], [0], [1], [0, 0, 1, 1], [], []>} : vector<8x128xf32>, vector<128x128xf32>, vector<8x128xf32> -> vector<8x128xf32>
    %c2_54 = arith.constant 2 : index
    %c0_55 = arith.constant 0 : index
    %c0_56 = arith.constant 0 : index
    %91 = vector.load %arg3[%c2_54, %c0_55, %c0_56] : memref<3x1x128xf32, #tpu.memory_space<vmem>>, vector<1x1x128xf32>
    %92 = vector.shape_cast %91 : vector<1x1x128xf32> to vector<1x128xf32>
    %93 = vector.broadcast %92 : vector<1x128xf32> to vector<8x128xf32>
    %94 = arith.addf %90, %93 : vector<8x128xf32>
    %cst_57 = arith.constant 0.000000e+00 : f32
    %95 = vector.broadcast %cst_57 : f32 to vector<8x128xf32>
    %96 = arith.maximumf %94, %95 : vector<8x128xf32>
    %c2_58 = arith.constant 2 : index
    %c0_59 = arith.constant 0 : index
    %c0_60 = arith.constant 0 : index
    %97 = vector.load %arg4[%c2_58, %c0_59, %c0_60] : memref<3x128x256xf32, #tpu.memory_space<vmem>>, vector<1x128x256xf32>
    %98 = vector.shape_cast %97 : vector<1x128x256xf32> to vector<128x256xf32>
    %cst_61 = arith.constant dense<0.000000e+00> : vector<8x256xf32>
    %99 = tpu.matmul %96, %98, %cst_61 {dimension_numbers = #tpu.dot_dimension_numbers<[1], [0], [0], [1], [0, 0, 1, 1], [], []>} : vector<8x128xf32>, vector<128x256xf32>, vector<8x256xf32> -> vector<8x256xf32>
    %c2_62 = arith.constant 2 : index
    %c0_63 = arith.constant 0 : index
    %c0_64 = arith.constant 0 : index
    %100 = vector.load %arg5[%c2_62, %c0_63, %c0_64] : memref<3x1x256xf32, #tpu.memory_space<vmem>>, vector<1x1x256xf32>
    %101 = vector.shape_cast %100 : vector<1x1x256xf32> to vector<1x256xf32>
    %102 = vector.broadcast %101 : vector<1x256xf32> to vector<8x256xf32>
    %103 = arith.addf %99, %102 : vector<8x256xf32>
    %104 = vector.extract_strided_slice %103 {offsets = [0, 0], sizes = [8, 128], strides = [1, 1]} : vector<8x256xf32> to vector<8x128xf32>
    %105 = vector.extract_strided_slice %103 {offsets = [0, 128], sizes = [8, 128], strides = [1, 1]} : vector<8x256xf32> to vector<8x128xf32>
    %106 = math.absf %105 : vector<8x128xf32>
    %cst_65 = arith.constant 0.000000e+00 : f32
    %107 = vector.broadcast %cst_65 : f32 to vector<8x128xf32>
    %108 = arith.subf %107, %106 : vector<8x128xf32>
    %109 = math.exp %108 : vector<8x128xf32>
    %cst_66 = arith.constant 1.000000e+00 : f32
    %110 = vector.broadcast %cst_66 : f32 to vector<8x128xf32>
    %111 = arith.addf %110, %109 : vector<8x128xf32>
    %cst_67 = arith.constant 0.000000e+00 : f32
    %112 = vector.broadcast %cst_67 : f32 to vector<8x128xf32>
    %113 = arith.cmpf oge, %105, %112 : vector<8x128xf32>
    %cst_68 = arith.constant 1.000000e+00 : f32
    %114 = vector.broadcast %cst_68 : f32 to vector<8x128xf32>
    %115 = arith.select %113, %114, %109 : vector<8x128xi1>, vector<8x128xf32>
    %116 = arith.divf %115, %111 : vector<8x128xf32>
    %cst_69 = arith.constant 0.000000e+00 : f32
    %117 = vector.broadcast %cst_69 : f32 to vector<8x128xf32>
    %118 = arith.minimumf %105, %117 : vector<8x128xf32>
    %119 = math.log %111 : vector<8x128xf32>
    %120 = arith.subf %118, %119 : vector<8x128xf32>
    %121 = arith.mulf %116, %84 : vector<8x128xf32>
    %cst_70 = arith.constant 1.000000e+00 : f32
    %122 = vector.broadcast %cst_70 : f32 to vector<8x128xf32>
    %123 = arith.subf %122, %116 : vector<8x128xf32>
    %124 = arith.mulf %123, %104 : vector<8x128xf32>
    %125 = arith.addf %121, %124 : vector<8x128xf32>
    %cst_71 = arith.constant dense<0.000000e+00> : vector<8xf32>
    %126 = vector.multi_reduction <add>, %120, %cst_71 [1] : vector<8x128xf32> to vector<8xf32>
    %127 = vector.shape_cast %126 : vector<8xf32> to vector<8x1xf32>
    %128 = arith.addf %87, %127 : vector<8x1xf32>
    %cst_72 = arith.constant 199.626389 : f32
    %129 = vector.broadcast %cst_72 : f32 to vector<8x1xf32>
    %130 = arith.addf %128, %129 : vector<8x1xf32>
    %131 = vector.extract_strided_slice %125 {offsets = [0, 0], sizes = [8, 32], strides = [1, 1]} : vector<8x128xf32> to vector<8x32xf32>
    %c0_73 = arith.constant 0 : index
    %c0_74 = arith.constant 0 : index
    %132 = vector.load %arg6[%c0_73, %c0_74] : memref<8x32xf32, #tpu.memory_space<vmem>>, vector<8x32xf32>
    tpu.vector_store %arg6[%c0_73, %c0_74], %131 {strides = array<i32>} : memref<8x32xf32, #tpu.memory_space<vmem>>, vector<8x32xf32>,
    %c0_75 = arith.constant 0 : index
    %c0_76 = arith.constant 0 : index
    %133 = vector.load %arg7[%c0_75, %c0_76] : memref<8x1xf32, #tpu.memory_space<vmem>>, vector<8x1xf32>
    tpu.vector_store %arg7[%c0_75, %c0_76], %130 {strides = array<i32>} : memref<8x1xf32, #tpu.memory_space<vmem>>, vector<8x1xf32>,
    return
  }
  func.func @transform_0(%arg0: i32) -> (i32, i32) {
    %c0_i32 = arith.constant 0 : i32
    %c0_i32_0 = arith.constant 0 : i32
    return %arg0, %c0_i32 : i32, i32
  }
  func.func @transform_1(%arg0: i32) -> (i32, i32, i32) {
    %c0_i32 = arith.constant 0 : i32
    %c0_i32_0 = arith.constant 0 : i32
    %c0_i32_1 = arith.constant 0 : i32
    %c0_i32_2 = arith.constant 0 : i32
    return %c0_i32, %c0_i32_0, %c0_i32_1 : i32, i32, i32
  }
  func.func @transform_2(%arg0: i32) -> (i32, i32, i32) {
    %c0_i32 = arith.constant 0 : i32
    %c0_i32_0 = arith.constant 0 : i32
    %c0_i32_1 = arith.constant 0 : i32
    %c0_i32_2 = arith.constant 0 : i32
    return %c0_i32, %c0_i32_0, %c0_i32_1 : i32, i32, i32
  }
  func.func @transform_3(%arg0: i32) -> (i32, i32, i32) {
    %c0_i32 = arith.constant 0 : i32
    %c0_i32_0 = arith.constant 0 : i32
    %c0_i32_1 = arith.constant 0 : i32
    %c0_i32_2 = arith.constant 0 : i32
    return %c0_i32, %c0_i32_0, %c0_i32_1 : i32, i32, i32
  }
  func.func @transform_4(%arg0: i32) -> (i32, i32, i32) {
    %c0_i32 = arith.constant 0 : i32
    %c0_i32_0 = arith.constant 0 : i32
    %c0_i32_1 = arith.constant 0 : i32
    %c0_i32_2 = arith.constant 0 : i32
    return %c0_i32, %c0_i32_0, %c0_i32_1 : i32, i32, i32
  }
  func.func @transform_5(%arg0: i32) -> (i32, i32) {
    %c0_i32 = arith.constant 0 : i32
    %c0_i32_0 = arith.constant 0 : i32
    return %arg0, %c0_i32 : i32, i32
  }
  func.func @transform_6(%arg0: i32) -> (i32, i32) {
    %c0_i32 = arith.constant 0 : i32
    %c0_i32_0 = arith.constant 0 : i32
    return %arg0, %c0_i32 : i32, i32
  }
}

</mosaic_0001>

<bundles_post_ra>
// kernel: iaf_flow_forward.1
= control target key start
LH: loop header
LB: loop body
LE: loop exit
PB: predicated region body
PF: predicated region fallthrough
CT: control target
= control target key end

     0   :  { %12 = vsyncpa [#allocation4], 0  ;;  %s825_s0 = inlined_call_operand.hbm [shape: f32[8,32], index: 0, kind: input, shape index: {}]   ;;  %s826_s1 = inlined_call_operand.hbm [shape: f32[3,128,128], index: 1, kind: input, shape index: {}]   ;;  %s827_s2 = inlined_call_operand.hbm [shape: f32[3,1,128], index: 2, kind: input, shape index: {}]   ;;  %s828_s3 = inlined_call_operand.hbm [shape: f32[3,128,256], index: 3, kind: input, shape index: {}]   ;;  %s829_s4 = inlined_call_operand.hbm [shape: f32[3,1,256], index: 4, kind: input, shape index: {}]   ;;  %s830_s5 = inlined_call_operand.vmem [shape: f32[8,32], index: 5, kind: output, shape index: {0}]   ;;  %s831_s6 = inlined_call_operand.vmem [shape: f32[8,1], index: 6, kind: output, shape index: {1}]  }
   0x1   :  { %13 = vsyncpa [#allocation6], 0  ;;  %s30_s23 = sshll.u32 %s826_s1, 4  ;;  %s31_s23 = int_to_ptr.hbm [resolvable:$true] %s30_s23 }
   0x2   :  { %14 = vsyncpa [#allocation9], 0  ;;  %s742_s24 = smov [#allocation5]   ;;  %s743_s26 = smov 128  }
   0x3   :  { %s32_s25 = sshll.u32 %s742_s24, 4  ;;  %s744_s27 = smov 8   ;;  %s33_s25 = int_to_ptr.vmem [resolvable:$true] %s32_s25 }
   0x4   :  { %38 = dma.hbm_to_vmem [thread:$0]  %s31_s23, 6144, %s33_s25, [#allocation6], %s743_s26, %s743_s26, %s744_s27  }
   0x5   :  { %s56_s30 = sshll.u32 %s828_s3, 4  ;;  %s745_s7 = smov [#allocation8]   ;;  %s57_s30 = int_to_ptr.hbm [resolvable:$true] %s56_s30 }
   0x6   :  { %s58_s8 = sshll.u32 %s745_s7, 4  ;;  %s746_s9 = smov 256   ;;  %s59_s8 = int_to_ptr.vmem [resolvable:$true] %s58_s8 }
   0x7   :  { %s747_s10 = smov 16   ;;  %s20_s12 = sshll.u32 %s825_s0, 4  ;;  %s21_s12 = int_to_ptr.hbm [resolvable:$true] %s20_s12 }
   0x8   :  { %64 = dma.hbm_to_vmem [thread:$0]  %s57_s30, 12288, %s59_s8, [#allocation9], %s746_s9, %s746_s9, %s747_s10  }
   0x9   :  { %s748_s13 = smov [#allocation3]   ;;  %s43_s17 = sshll.u32 %s827_s2, 4  ;;  %s44_s17 = int_to_ptr.hbm [resolvable:$true] %s43_s17 }
   0xa   :  { %s22_s14 = sshll.u32 %s748_s13, 4  ;;  %s749_s3 = smov [#allocation7]   ;;  %s23_s14 = int_to_ptr.vmem [resolvable:$true] %s22_s14 }
   0xb   :  { %25 = dma.hbm_to_vmem [thread:$0]  %s21_s12, 128, %s23_s14, [#allocation4]  }
   0xc   :  { %s45_s18 = sshll.u32 %s749_s3, 4  ;;  %s69_s21 = sshll.u32 %s829_s4, 4  ;;  %s46_s18 = int_to_ptr.vmem [resolvable:$true] %s45_s18  ;;  %s70_s21 = int_to_ptr.hbm [resolvable:$true] %s69_s21 }
   0xd   :  { %s750_s22 = smov 1   ;;  %s751_s0 = smov [#allocation10]  }
   0xe   :  { %51 = dma.hbm_to_vmem [thread:$0]  %s44_s17, 48, %s46_s18, [#allocation6], %s747_s10, %s747_s10, %s750_s22  }
   0xf   :  { %s71_s23 = sshll.u32 %s751_s0, 4  ;;  %s752_s24 = smov 32   ;;  %s72_s23 = int_to_ptr.vmem [resolvable:$true] %s71_s23 }
  0x10   :  { %s753_s25 = smov 2  }
  0x11   :  { %77 = dma.hbm_to_vmem [thread:$0]  %s70_s21, 96, %s72_s23, [#allocation9], %s752_s24, %s752_s24, %s753_s25  }
  0x12   :  { %736 = dma.done.wait [#allocation4], 128  }
  0x13   :  { %737 = vsyncadd [#allocation4], 4294967168 }
  0x14   :  { %738 = dma.done.wait [#allocation6], 6192  }
  0x15   :  { %739 = vsyncadd [#allocation6], 4294961104 }
  0x16   :  { %740 = dma.done.wait [#allocation9], 12384  }
  0x17   :  { %741 = vsyncadd [#allocation9], 4294954912  ;;  %v754_v0 = vmov 0.0   ;;  %v118_v1 = vld [vmem:[#allocation5 + $0x78] sm:$0xff]  ;;  %v117_v2 = vld [vmem:[#allocation5 + $0x70] sm:$0xff]  ;;  %vm100_vm0 = vcmask 261120  }
  0x18   :  { %98 = vst [vmem:[#allocation2] sm:$0xff] %v754_v0  ;;  %123 = vmatpush.msra.mxu0 %v118_v1  ;;  %v116_v3 = vld [vmem:[#allocation5 + $0x68] sm:$0xff]  ;;  %v115_v4 = vld [vmem:[#allocation5 + $0x60] sm:$0xff]  ;;  %v114_v5 = vld [vmem:[#allocation5 + $0x58] sm:$0xff] }
  0x19   :  { %v99_v6 = vld [vmem:[#allocation3] sm:$0xff]  ;;  %v172_v9 = vld [vmem:[#allocation8 + $0xe0] sm:$0xff]  ;;  %v173_v10 = vld [vmem:[#allocation8 + $0xe8] sm:$0xff] }
  0x1a   :  { %124 = vmatpush.msra.mxu0 %v117_v2  ;;  %v174_v7 = vld [vmem:[#allocation8 + $0xf0] sm:$0xff]  ;;  %101 = vst.msk [vmem:[#allocation2] sm:$0xff] %vm100_vm0, %v99_v6  ;;  %v175_v8 = vld [vmem:[#allocation8 + $0xf8] sm:$0xff]  ;;  %v168_v14 = vld [vmem:[#allocation8 + $0xc0] sm:$0xff] }
  0x1b   :  { %182 = vmatpush.msra.mxu1 %v174_v7  ;;  %202 = vmatpush.msra.mxu2 %v175_v8  ;;  %v170_v11 = vld [vmem:[#allocation8 + $0xd0] sm:$0xff]  ;;  %v171_v13 = vld [vmem:[#allocation8 + $0xd8] sm:$0xff]  ;;  %v112_v15 = vld [vmem:[#allocation5 + $0x48] sm:$0xff] }
  0x1c   :  { %125 = vmatpush.msra.mxu0 %v116_v3  ;;  %v113_v12 = vld [vmem:[#allocation5 + $0x50] sm:$0xff]  ;;  %v111_v18 = vld [vmem:[#allocation5 + $0x40] sm:$0xff]  ;;  %v110_v21 = vld [vmem:[#allocation5 + $0x38] sm:$0xff] }
  0x1d   :  { %183 = vmatpush.msra.mxu1 %v172_v9  ;;  %203 = vmatpush.msra.mxu2 %v173_v10  ;;  %v169_v16 = vld [vmem:[#allocation8 + $0xc8] sm:$0xff]  ;;  %v166_v17 = vld [vmem:[#allocation8 + $0xb0] sm:$0xff]  ;;  %v167_v19 = vld [vmem:[#allocation8 + $0xb8] sm:$0xff] }
  0x1e   :  { %126 = vmatpush.msra.mxu0 %v115_v4  ;;  %v164_v20 = vld [vmem:[#allocation8 + $0xa0] sm:$0xff]  ;;  %v165_v22 = vld [vmem:[#allocation8 + $0xa8] sm:$0xff]  ;;  %v162_v23 = vld [vmem:[#allocation8 + $0x90] sm:$0xff] }
  0x1f   :  { %184 = vmatpush.msra.mxu1 %v170_v11  ;;  %204 = vmatpush.msra.mxu2 %v171_v13  ;;  %v109_v24 = vld [vmem:[#allocation5 + $0x30] sm:$0xff]  ;;  %v163_v25 = vld [vmem:[#allocation8 + $0x98] sm:$0xff]  ;;  %v160_v26 = vld [vmem:[#allocation8 + $0x80] sm:$0xff] }
  0x20   :  { %127 = vmatpush.msra.mxu0 %v114_v5  ;;  %v108_v27 = vld [vmem:[#allocation5 + $0x28] sm:$0xff]  ;;  %v158_v29 = vld [vmem:[#allocation8 + $0x70] sm:$0xff]  ;;  %v107_v30 = vld [vmem:[#allocation5 + $0x20] sm:$0xff] }
  0x21   :  { %185 = vmatpush.msra.mxu1 %v168_v14  ;;  %205 = vmatpush.msra.mxu2 %v169_v16  ;;  %v161_v28 = vld [vmem:[#allocation8 + $0x88] sm:$0xff]  ;;  %v159_v31 = vld [vmem:[#allocation8 + $0x78] sm:$0xff]  ;;  %v156_v32 = vld [vmem:[#allocation8 + $0x60] sm:$0xff] }
  0x22   :  { %128 = vmatpush.msra.mxu0 %v113_v12  ;;  %v106_v33 = vld [vmem:[#allocation5 + $0x18] sm:$0xff]  ;;  %v157_v34 = vld [vmem:[#allocation8 + $0x68] sm:$0xff]  ;;  %v152_v38 = vld [vmem:[#allocation8 + $0x40] sm:$0xff] }
  0x23   :  { %186 = vmatpush.msra.mxu1 %v166_v17  ;;  %206 = vmatpush.msra.mxu2 %v167_v19  ;;  %v154_v35 = vld [vmem:[#allocation8 + $0x50] sm:$0xff]  ;;  %v155_v37 = vld [vmem:[#allocation8 + $0x58] sm:$0xff]  ;;  %v104_v39 = vld [vmem:[#allocation5 + $0x8] sm:$0xff] }
  0x24   :  { %129 = vmatpush.msra.mxu0 %v112_v15  ;;  %v105_v36 = vld [vmem:[#allocation5 + $0x10] sm:$0xff]  ;;  %v103_v42 = vld [vmem:[#allocation5] sm:$0xff]  ;;  %v271_v55 = vld [vmem:[#allocation5 + $0xf8] sm:$0xff] }
  0x25   :  { %187 = vmatpush.msra.mxu1 %v164_v20  ;;  %207 = vmatpush.msra.mxu2 %v165_v22  ;;  %v153_v40 = vld [vmem:[#allocation8 + $0x48] sm:$0xff]  ;;  %v150_v41 = vld [vmem:[#allocation8 + $0x30] sm:$0xff]  ;;  %v151_v43 = vld [vmem:[#allocation8 + $0x38] sm:$0xff] }
  0x26   :  { %130 = vmatpush.msra.mxu0 %v111_v18  ;;  %v806_v44 = vld [vmem:[#allocation2] sm:$0xff]  ;;  %v148_v45 = vld [vmem:[#allocation8 + $0x20] sm:$0xff]  ;;  %v147_v48 = vld [vmem:[#allocation8 + $0x18] sm:$0xff]  ;;  %277 = vmatpush.msra.mxu3 %v271_v55 }
  0x27   :  { %188 = vmatpush.msra.mxu1 %v162_v23  ;;  %208 = vmatpush.msra.mxu2 %v163_v25  ;;  %v149_v46 = vld [vmem:[#allocation8 + $0x28] sm:$0xff]  ;;  %v146_v47 = vld [vmem:[#allocation8 + $0x10] sm:$0xff]  ;;  %v144_v49 = vld [vmem:[#allocation8] sm:$0xff] }
  0x28   :  { %131 = vmatpush.msra.mxu0 %v110_v21  ;;  %v145_v50 = vld [vmem:[#allocation8 + $0x8] sm:$0xff]  ;;  %v595_v51 = vld [vmem:[#allocation7] ss:$0 sm:$0xff]  ;;  %v267_v59 = vld [vmem:[#allocation5 + $0xd8] sm:$0xff] }
  0x29   :  { %189 = vmatpush.msra.mxu1 %v160_v26  ;;  %209 = vmatpush.msra.mxu2 %v161_v28  ;;  %v270_v56 = vld [vmem:[#allocation5 + $0xf0] sm:$0xff]  ;;  %v269_v57 = vld [vmem:[#allocation5 + $0xe8] sm:$0xff]  ;;  %v268_v58 = vld [vmem:[#allocation5 + $0xe0] sm:$0xff] }
  0x2a   :  { %132 = vmatpush.msra.mxu0 %v109_v24  ;;  %278 = vmatpush.msra.mxu3 %v270_v56  ;;  %v266_v60 = vld [vmem:[#allocation5 + $0xd0] sm:$0xff]  ;;  %v265_v61 = vld [vmem:[#allocation5 + $0xc8] sm:$0xff]  ;;  %v264_v62 = vld [vmem:[#allocation5 + $0xc0] sm:$0xff] }
  0x2b   :  { %190 = vmatpush.msra.mxu1 %v158_v29  ;;  %210 = vmatpush.msra.mxu2 %v159_v31  ;;  %v263_v63 = vld [vmem:[#allocation5 + $0xb8] sm:$0xff]  ;;  %v176_v0 = vld [vmem:[#allocation10] sm:$0x3]  ;;  %v262_v2 = vld [vmem:[#allocation5 + $0xb0] sm:$0xff] }
  0x2c   :  { %133 = vmatpush.msra.mxu0 %v108_v27  ;;  %279 = vmatpush.msra.mxu3 %v269_v57  ;;  %v179_v1 = vperm.slane %v176_v0, 1  ;;  %v261_v3 = vld [vmem:[#allocation5 + $0xa8] sm:$0xff]  ;;  %v260_v5 = vld [vmem:[#allocation5 + $0xa0] sm:$0xff]  ;;  %v259_v7 = vld [vmem:[#allocation5 + $0x98] sm:$0xff]  ;;  %v178_v28 = vperm.slane %v176_v0, 0 }
  0x2d   :  { %191 = vmatpush.msra.mxu1 %v156_v32  ;;  %211 = vmatpush.msra.mxu2 %v157_v34  ;;  %v258_v9 = vld [vmem:[#allocation5 + $0x90] sm:$0xff]  ;;  %v257_v11 = vld [vmem:[#allocation5 + $0x88] sm:$0xff]  ;;  %v256_v13 = vld [vmem:[#allocation5 + $0x80] sm:$0xff] }
  0x2e   :  { %134 = vmatpush.msra.mxu0 %v107_v30  ;;  %280 = vmatpush.msra.mxu3 %v268_v58  ;;  %v313_v55 = vld [vmem:[#allocation8 + $0x170] sm:$0xff]  ;;  %v314_v56 = vld [vmem:[#allocation8 + $0x178] sm:$0xff]  ;;  %v311_v57 = vld [vmem:[#allocation8 + $0x160] sm:$0xff] }
  0x2f   :  { %192 = vmatpush.msra.mxu1 %v154_v35  ;;  %212 = vmatpush.msra.mxu2 %v155_v37  ;;  %v312_v58 = vld [vmem:[#allocation8 + $0x168] sm:$0xff]  ;;  %v306_v0 = vld [vmem:[#allocation8 + $0x138] sm:$0xff] }
  0x30   :  { %135 = vmatpush.msra.mxu0 %v106_v33  ;;  %281 = vmatpush.msra.mxu3 %v267_v59  ;;  %v309_v59 = vld [vmem:[#allocation8 + $0x150] sm:$0xff] }
  0x31   :  { %193 = vmatpush.msra.mxu1 %v152_v38  ;;  %213 = vmatpush.msra.mxu2 %v153_v40  ;;  %v330_v40 = vld [vmem:[#allocation8 + $0x1f8] sm:$0xff] }
  0x32   :  { %136 = vmatpush.msra.mxu0 %v105_v36  ;;  %282 = vmatpush.msra.mxu3 %v266_v60  ;;  %v310_v60 = vld [vmem:[#allocation8 + $0x158] sm:$0xff] }
  0x33   :  { %194 = vmatpush.msra.mxu1 %v150_v41  ;;  %214 = vmatpush.msra.mxu2 %v151_v43  ;;  %v327_v41 = vld [vmem:[#allocation8 + $0x1e0] sm:$0xff]  ;;  %v325_v43 = vld [vmem:[#allocation8 + $0x1d0] sm:$0xff] }
  0x34   :  { %137 = vmatpush.msra.mxu0 %v104_v39  ;;  %283 = vmatpush.msra.mxu3 %v265_v61  ;;  %v329_v39 = vld [vmem:[#allocation8 + $0x1f0] sm:$0xff]  ;;  %v307_v61 = vld [vmem:[#allocation8 + $0x140] sm:$0xff] }
  0x35   :  { %195 = vmatpush.msra.mxu1 %v148_v45  ;;  %215 = vmatpush.msra.mxu2 %v149_v46  ;;  %v326_v45 = vld [vmem:[#allocation8 + $0x1d8] sm:$0xff]  ;;  %v323_v46 = vld [vmem:[#allocation8 + $0x1c0] sm:$0xff] }
  0x36   :  { %138 = vmatpush.msra.mxu0 %v103_v42  ;;  %284 = vmatpush.msra.mxu3 %v264_v62  ;;  %v328_v42 = vld [vmem:[#allocation8 + $0x1e8] sm:$0xff] }
  0x37   :  { %139 = vmatmul.f32.vlgmr.msra.gmra.mxu0 %v806_v44  ;;  %196 = vmatpush.msra.mxu1 %v146_v47  ;;  %v324_v47 = vld [vmem:[#allocation8 + $0x1c8] sm:$0xff] }
  0x38   :  { %216 = vmatpush.msra.mxu2 %v147_v48  ;;  %285 = vmatpush.msra.mxu3 %v263_v63  ;;  %v322_v48 = vld [vmem:[#allocation8 + $0x1b8] sm:$0xff]  ;;  %v308_v62 = vld [vmem:[#allocation8 + $0x148] sm:$0xff]  ;;  %v305_v63 = vld [vmem:[#allocation8 + $0x130] sm:$0xff] }
  0x39   :  { %197 = vmatpush.msra.mxu1 %v144_v49  ;;  %338 = vmatpush.msrb.mxu0 %v329_v39  ;;  %v319_v49 = vld [vmem:[#allocation8 + $0x1a0] sm:$0xff] }
  0x3a   :  { %217 = vmatpush.msra.mxu2 %v145_v50  ;;  %286 = vmatpush.msra.mxu3 %v262_v2  ;;  %v320_v50 = vld [vmem:[#allocation8 + $0x1a8] sm:$0xff] }
  0x3b   :  { %358 = vmatpush.msrb.mxu1 %v330_v40  ;;  %339 = vmatpush.msrb.mxu0 %v327_v41  ;;  %v304_v2 = vld [vmem:[#allocation8 + $0x128] sm:$0xff] }
  0x3c   :  { %287 = vmatpush.msra.mxu3 %v261_v3  ;;  %v301_v3 = vld [vmem:[#allocation8 + $0x110] sm:$0xff] }
  0x3d   :  { %359 = vmatpush.msrb.mxu1 %v328_v42  ;;  %340 = vmatpush.msrb.mxu0 %v325_v43 }
  0x3e   :  { %288 = vmatpush.msra.mxu3 %v260_v5  ;;  %v299_v5 = vld [vmem:[#allocation8 + $0x100] sm:$0xff] }
  0x3f   :  { %360 = vmatpush.msrb.mxu1 %v326_v45  ;;  %341 = vmatpush.msrb.mxu0 %v323_v46 }
  0x40   :  { %289 = vmatpush.msra.mxu3 %v259_v7  ;;  %v596_v7 = vld [vmem:[#allocation7 + $0x1] ss:$0 sm:$0xff] }
  0x41   :  { %361 = vmatpush.msrb.mxu1 %v324_v47 }
  0x42   :  { %290 = vmatpush.msra.mxu3 %v258_v9 }
  0x43   :  { %362 = vmatpush.msrb.mxu1 %v322_v48 }
  0x44   :  { %291 = vmatpush.msra.mxu3 %v257_v11  ;;  %v427_v11 = vld [vmem:[#allocation5 + $0x178] sm:$0xff] }
  0x45   :  { %363 = vmatpush.msrb.mxu1 %v320_v50  ;;  %433 = vmatpush.msrb.mxu2 %v427_v11  ;;  %v469_v11 = vld [vmem:[#allocation8 + $0x270] sm:$0xff] }
  0x46   :  { %292 = vmatpush.msra.mxu3 %v256_v13  ;;  %v425_v13 = vld [vmem:[#allocation5 + $0x168] sm:$0xff] }
  0xb4   :  { %v140_v52 = vpop.f32.mrf.mxu0 }
  0xb5   :  { %v141_v53 = vadd.f32 %v595_v51, %v140_v52  ;;  %v317_v51 = vld [vmem:[#allocation8 + $0x190] sm:$0xff]  ;;  %v318_v52 = vld [vmem:[#allocation8 + $0x198] sm:$0xff] }
  0xb6   :  { %364 = vmatpush.msrb.mxu1 %v318_v52 }
  0xb7   :  { %v143_v54 = vmax.f32 %v141_v53, 0.0  ;;  %v315_v53 = vld [vmem:[#allocation8 + $0x180] sm:$0xff] }
  0xb9   :  { %198 = vmatmul.f32.vlgmr.msra.gmra.mxu1 %v143_v54  ;;  %218 = vmatmul.f32.vlgmr.msra.gmra.mxu2 %v143_v54  ;;  %v316_v54 = vld [vmem:[#allocation8 + $0x188] sm:$0xff] }
  0xba   :  { %365 = vmatpush.msrb.mxu1 %v316_v54 }
  0xbc   :  { %366 = vmatpush.msrb.mxu1 %v314_v56 }
  0xbe   :  { %367 = vmatpush.msrb.mxu1 %v312_v58 }
  0xc0   :  { %368 = vmatpush.msrb.mxu1 %v310_v60  ;;  %v485_v60 = vld [vmem:[#allocation8 + $0x2f0] sm:$0xff] }
  0xc1   :  { %494 = vmatpush.msrb.mxu3 %v485_v60 }
  0xc2   :  { %369 = vmatpush.msrb.mxu1 %v308_v62  ;;  %v483_v62 = vld [vmem:[#allocation8 + $0x2e0] sm:$0xff] }
  0xc3   :  { %495 = vmatpush.msrb.mxu3 %v483_v62 }
  0xc4   :  { %370 = vmatpush.msrb.mxu1 %v306_v0  ;;  %v481_v0 = vld [vmem:[#allocation8 + $0x2d0] sm:$0xff] }
  0xc5   :  { %496 = vmatpush.msrb.mxu3 %v481_v0 }
  0xc6   :  { %371 = vmatpush.msrb.mxu1 %v304_v2  ;;  %v479_v2 = vld [vmem:[#allocation8 + $0x2c0] sm:$0xff] }
  0xc7   :  { %497 = vmatpush.msrb.mxu3 %v479_v2 }
 0x136   :  { %v199_v30 = vpop.f32.mrf.mxu1 }
 0x137   :  { %v200_v34 = vadd.f32 %v199_v30, %v178_v28  ;;  %v415_v28 = vld [vmem:[#allocation5 + $0x118] sm:$0xff] }
 0x13c   :  { %v219_v4 = vpop.f32.mrf.mxu2 }
 0x13d   :  { %v220_v6 = vadd.f32 %v219_v4, %v179_v1  ;;  %v303_v1 = vld [vmem:[#allocation8 + $0x120] sm:$0xff]  ;;  %v302_v4 = vld [vmem:[#allocation8 + $0x118] sm:$0xff] }
 0x13e   :  { %372 = vmatpush.msrb.mxu1 %v302_v4  ;;  %v478_v4 = vld [vmem:[#allocation8 + $0x2b8] sm:$0xff] }
 0x13f   :  { %v222_v8 = vand.u32 2147483647, %v220_v6  ;;  %v244_v19 = vmin.f32 %v220_v6, 0.0  ;;  %vm227_vm4 = vcmp.ge.f32.partialorder %v220_v6, 0.0  ;;  %v300_v6 = vld [vmem:[#allocation8 + $0x108] sm:$0xff] }
 0x140   :  { %373 = vmatpush.msrb.mxu1 %v300_v6  ;;  %v476_v6 = vld [vmem:[#allocation8 + $0x2a8] sm:$0xff] }
 0x141   :  { %v223_v10 = vsub.f32 0.0, %v222_v8 }
 0x143   :  { %v224_v12 = vmul.f32 1.442695, %v223_v10 }
 0x145   :  { %598 = vpow2.f32 %v224_v12  ;;  %v426_v12 = vld [vmem:[#allocation5 + $0x170] sm:$0xff] }
 0x146   :  { %434 = vmatpush.msrb.mxu2 %v426_v12  ;;  %v470_v12 = vld [vmem:[#allocation8 + $0x278] sm:$0xff] }
 0x148   :  { %435 = vmatpush.msrb.mxu2 %v425_v13  ;;  %v467_v13 = vld [vmem:[#allocation8 + $0x260] sm:$0xff] }
 0x14b   :  { %v599_v14 = vpop.eup %598 }
 0x14c   :  { %v226_v15 = vadd.f32 1.0, %v599_v14  ;;  %v228_v31 = vsel %vm227_vm4, 1.0, %v599_v14  ;;  %v424_v14 = vld [vmem:[#allocation5 + $0x160] sm:$0xff] }
 0x14d   :  { %436 = vmatpush.msrb.mxu2 %v424_v14  ;;  %v468_v14 = vld [vmem:[#allocation8 + $0x268] sm:$0xff] }
 0x14e   :  { %600 = vrcp.f32 %v226_v15  ;;  %v240_v23 = vand.u32 2147483648, %v226_v15  ;;  %v238_v25 = vand.u32 2147483647, %v226_v15  ;;  %vm234_vm2 = vweird.f32 %v226_v15 }
 0x14f   :  { %602 = vlog2.f32 %v226_v15 }
 0x150   :  { %v241_v27 = vor.u32 1.1754944e-38, %v240_v23  ;;  %vm239_vm5 = vcmp.eq.f32.partialorder %v238_v25, 8.507059e+37 }
 0x154   :  { %v601_v16 = vpop.eup %600 }
 0x155   :  { %v603_v17 = vpop.eup %602  ;;  %v230_v18 = vmul.f32 %v601_v16, %v226_v15  ;;  %vm235_vm1 = vweird.f32 %v601_v16  ;;  %v423_v15 = vld [vmem:[#allocation5 + $0x158] sm:$0xff] }
 0x156   :  { %v246_v20 = vmul.f32 0.6931472, %v603_v17  ;;  %vm236_vm3 = vmor %vm234_vm2, %vm235_vm1  ;;  %437 = vmatpush.msrb.mxu2 %v423_v15  ;;  %v421_v17 = vld [vmem:[#allocation5 + $0x148] sm:$0xff]  ;;  %v465_v15 = vld [vmem:[#allocation8 + $0x250] sm:$0xff]  ;;  %vm569_vm1 = vcmask 7168  }
 0x157   :  { %v231_v21 = vsub.f32 1.0, %v230_v18  ;;  %v332_v18 = vld [vmem:[#allocation10 + $0x2] sm:$0x3] }
 0x158   :  { %v247_v22 = vsub.f32 %v244_v19, %v246_v20  ;;  %v420_v19 = vld [vmem:[#allocation5 + $0x140] sm:$0xff]  ;;  %v419_v20 = vld [vmem:[#allocation5 + $0x138] sm:$0xff] }
 0x159   :  { %v232_v24 = vmul.f32 %v601_v16, %v231_v21  ;;  %v335_v21 = vperm.slane %v332_v18, 1 }
 0x15a   :  { %252 = vadd.xlane.f32.xlu0 %v247_v22  ;;  %v418_v22 = vld [vmem:[#allocation5 + $0x130] sm:$0xff] }
 0x15b   :  { %v233_v26 = vadd.f32 %v601_v16, %v232_v24  ;;  %v417_v24 = vld [vmem:[#allocation5 + $0x128] sm:$0xff] }
 0x15d   :  { %v237_v29 = vsel %vm236_vm3, %v601_v16, %v233_v26  ;;  %v422_v16 = vld [vmem:[#allocation5 + $0x150] sm:$0xff]  ;;  %v416_v26 = vld [vmem:[#allocation5 + $0x120] sm:$0xff] }
 0x15e   :  { %v242_v32 = vsel %vm239_vm5, %v241_v27, %v237_v29  ;;  %438 = vmatpush.msrb.mxu2 %v422_v16  ;;  %v414_v29 = vld [vmem:[#allocation5 + $0x110] sm:$0xff]  ;;  %v466_v16 = vld [vmem:[#allocation8 + $0x258] sm:$0xff] }
 0x15f   :  { %v243_v33 = vmul.f32 %v242_v32, %v228_v31  ;;  %v413_v31 = vld [vmem:[#allocation5 + $0x108] sm:$0xff] }
 0x160   :  { %439 = vmatpush.msrb.mxu2 %v421_v17  ;;  %v463_v17 = vld [vmem:[#allocation8 + $0x240] sm:$0xff] }
 0x161   :  { %v249_v35 = vsub.f32 1.0, %v243_v33  ;;  %v248_v36 = vmul.f32 %v243_v33, %v806_v44  ;;  %v321_v44 = vld [vmem:[#allocation8 + $0x1b0] sm:$0xff]  ;;  %v412_v33 = vld [vmem:[#allocation5 + $0x100] sm:$0xff] }
 0x162   :  { %342 = vmatpush.msrb.mxu0 %v321_v44  ;;  %440 = vmatpush.msrb.mxu2 %v420_v19  ;;  %v461_v19 = vld [vmem:[#allocation8 + $0x230] sm:$0xff] }
 0x163   :  { %v250_v37 = vmul.f32 %v249_v35, %v200_v34 }
 0x164   :  { %343 = vmatpush.msrb.mxu0 %v319_v49  ;;  %441 = vmatpush.msrb.mxu2 %v419_v20  ;;  %v334_v49 = vperm.slane %v332_v18, 0  ;;  %v464_v18 = vld [vmem:[#allocation8 + $0x248] sm:$0xff]  ;;  %v462_v20 = vld [vmem:[#allocation8 + $0x238] sm:$0xff] }
 0x165   :  { %v810_v38 = vadd.f32 %v250_v37, %v248_v36 }
 0x166   :  { %344 = vmatpush.msrb.mxu0 %v317_v51  ;;  %442 = vmatpush.msrb.mxu2 %v418_v22  ;;  %v460_v22 = vld [vmem:[#allocation8 + $0x228] sm:$0xff] }
 0x167   :  { %293 = vmatmul.f32.vlgmr.msra.gmra.mxu3 %v810_v38 }
 0x168   :  { %345 = vmatpush.msrb.mxu0 %v315_v53  ;;  %443 = vmatpush.msrb.mxu2 %v417_v24  ;;  %v458_v24 = vld [vmem:[#allocation8 + $0x218] sm:$0xff] }
 0x16a   :  { %346 = vmatpush.msrb.mxu0 %v313_v55  ;;  %444 = vmatpush.msrb.mxu2 %v416_v26  ;;  %v456_v26 = vld [vmem:[#allocation8 + $0x208] sm:$0xff] }
 0x16c   :  { %347 = vmatpush.msrb.mxu0 %v311_v57  ;;  %445 = vmatpush.msrb.mxu2 %v415_v28 }
 0x16e   :  { %348 = vmatpush.msrb.mxu0 %v309_v59  ;;  %446 = vmatpush.msrb.mxu2 %v414_v29 }
 0x170   :  { %349 = vmatpush.msrb.mxu0 %v307_v61  ;;  %447 = vmatpush.msrb.mxu2 %v413_v31  ;;  %v486_v61 = vld [vmem:[#allocation8 + $0x2f8] sm:$0xff]  ;;  %v488_v31 = vld [vmem:[#allocation10 + $0x4] sm:$0x3] }
 0x172   :  { %350 = vmatpush.msrb.mxu0 %v305_v63  ;;  %448 = vmatpush.msrb.mxu2 %v412_v33  ;;  %v484_v63 = vld [vmem:[#allocation8 + $0x2e8] sm:$0xff] }
 0x174   :  { %351 = vmatpush.msrb.mxu0 %v303_v1  ;;  %v482_v1 = vld [vmem:[#allocation8 + $0x2d8] sm:$0xff] }
 0x176   :  { %352 = vmatpush.msrb.mxu0 %v301_v3  ;;  %v480_v3 = vld [vmem:[#allocation8 + $0x2c8] sm:$0xff] }
 0x178   :  { %353 = vmatpush.msrb.mxu0 %v299_v5  ;;  %v475_v5 = vld [vmem:[#allocation8 + $0x2a0] sm:$0xff] }
 0x17a   :  { %514 = vmatpush.msra.mxu0 %v486_v61 }
 0x17c   :  { %515 = vmatpush.msra.mxu0 %v484_v63 }
 0x17e   :  { %516 = vmatpush.msra.mxu0 %v482_v1 }
 0x180   :  { %517 = vmatpush.msra.mxu0 %v480_v3 }
 0x182   :  { %518 = vmatpush.msra.mxu0 %v478_v4 }
 0x184   :  { %519 = vmatpush.msra.mxu0 %v476_v6 }
 0x1cd   :  { %v253_v1 = vpop.xlane.xlu0 %252 }
 0x1ea   :  { %v294_v8 = vpop.f32.mrf.mxu3 }
 0x1eb   :  { %v295_v9 = vadd.f32 %v596_v7, %v294_v8  ;;  %v473_v7 = vld [vmem:[#allocation8 + $0x290] sm:$0xff]  ;;  %v474_v8 = vld [vmem:[#allocation8 + $0x298] sm:$0xff] }
 0x1ec   :  { %520 = vmatpush.msra.mxu0 %v474_v8 }
 0x1ed   :  { %v297_v10 = vmax.f32 %v295_v9, 0.0  ;;  %v471_v9 = vld [vmem:[#allocation8 + $0x280] sm:$0xff] }
 0x1ef   :  { %354 = vmatmul.f32.vlgmr.msrb.gmra.mxu0 %v297_v10  ;;  %374 = vmatmul.f32.vlgmr.msrb.gmra.mxu1 %v297_v10  ;;  %v472_v10 = vld [vmem:[#allocation8 + $0x288] sm:$0xff] }
 0x1f0   :  { %521 = vmatpush.msra.mxu0 %v472_v10 }
 0x1f2   :  { %522 = vmatpush.msra.mxu0 %v470_v12 }
 0x1f4   :  { %523 = vmatpush.msra.mxu0 %v468_v14 }
 0x1f6   :  { %524 = vmatpush.msra.mxu0 %v466_v16 }
 0x1f8   :  { %525 = vmatpush.msra.mxu0 %v464_v18 }
 0x1fa   :  { %526 = vmatpush.msra.mxu0 %v462_v20 }
 0x1fc   :  { %527 = vmatpush.msra.mxu0 %v460_v22 }
 0x1fe   :  { %528 = vmatpush.msra.mxu0 %v458_v24 }
 0x200   :  { %529 = vmatpush.msra.mxu0 %v456_v26 }
 0x26c   :  { %v375_v23 = vpop.f32.mrf.mxu1  ;;  %v355_v51 = vpop.f32.mrf.mxu0 }
 0x26d   :  { %v376_v25 = vadd.f32 %v375_v23, %v335_v21  ;;  %v356_v55 = vadd.f32 %v355_v51, %v334_v49  ;;  %v459_v21 = vld [vmem:[#allocation8 + $0x220] sm:$0xff]  ;;  %v457_v23 = vld [vmem:[#allocation8 + $0x210] sm:$0xff] }
 0x26f   :  { %v378_v27 = vand.u32 2147483647, %v376_v25  ;;  %v400_v40 = vmin.f32 %v376_v25, 0.0  ;;  %vm383_vm9 = vcmp.ge.f32.partialorder %v376_v25, 0.0  ;;  %v455_v25 = vld [vmem:[#allocation8 + $0x200] sm:$0xff] }
 0x271   :  { %v379_v30 = vsub.f32 0.0, %v378_v27  ;;  %v597_v27 = vld [vmem:[#allocation7 + $0x2] ss:$0 sm:$0xff] }
 0x273   :  { %v380_v32 = vmul.f32 1.442695, %v379_v30 }
 0x275   :  { %604 = vpow2.f32 %v380_v32  ;;  %v491_v32 = vperm.slane %v488_v31, 1 }
 0x27b   :  { %v605_v34 = vpop.eup %604 }
 0x27c   :  { %v382_v35 = vadd.f32 1.0, %v605_v34  ;;  %v384_v52 = vsel %vm383_vm9, 1.0, %v605_v34 }
 0x27e   :  { %606 = vrcp.f32 %v382_v35  ;;  %v396_v43 = vand.u32 2147483648, %v382_v35  ;;  %v394_v47 = vand.u32 2147483647, %v382_v35  ;;  %vm390_vm7 = vweird.f32 %v382_v35 }
 0x27f   :  { %608 = vlog2.f32 %v382_v35 }
 0x280   :  { %v397_v48 = vor.u32 1.1754944e-38, %v396_v43  ;;  %vm395_vm10 = vcmp.eq.f32.partialorder %v394_v47, 8.507059e+37 }
 0x284   :  { %v607_v36 = vpop.eup %606 }
 0x285   :  { %v609_v37 = vpop.eup %608  ;;  %v386_v39 = vmul.f32 %v607_v36, %v382_v35  ;;  %vm391_vm6 = vweird.f32 %v607_v36 }
 0x286   :  { %v402_v41 = vmul.f32 0.6931472, %v609_v37  ;;  %vm392_vm8 = vmor %vm390_vm7, %vm391_vm6 }
 0x287   :  { %v387_v42 = vsub.f32 1.0, %v386_v39 }
 0x288   :  { %v403_v45 = vsub.f32 %v400_v40, %v402_v41 }
 0x289   :  { %v388_v46 = vmul.f32 %v607_v36, %v387_v42 }
 0x28a   :  { %408 = vadd.xlane.f32.xlu0 %v403_v45 }
 0x28b   :  { %v389_v44 = vadd.f32 %v607_v36, %v388_v46 }
 0x28d   :  { %v393_v50 = vsel %vm392_vm8, %v607_v36, %v389_v44 }
 0x28e   :  { %v398_v53 = vsel %vm395_vm10, %v397_v48, %v393_v50 }
 0x28f   :  { %v399_v54 = vmul.f32 %v398_v53, %v384_v52  ;;  %v490_v53 = vperm.slane %v488_v31, 0 }
 0x291   :  { %v405_v56 = vsub.f32 1.0, %v399_v54  ;;  %v404_v57 = vmul.f32 %v399_v54, %v810_v38  ;;  %v477_v38 = vld [vmem:[#allocation8 + $0x2b0] sm:$0xff] }
 0x292   :  { %498 = vmatpush.msrb.mxu3 %v477_v38 }
 0x293   :  { %v406_v58 = vmul.f32 %v405_v56, %v356_v55 }
 0x294   :  { %499 = vmatpush.msrb.mxu3 %v475_v5 }
 0x295   :  { %v814_v59 = vadd.f32 %v406_v58, %v404_v57 }
 0x296   :  { %500 = vmatpush.msrb.mxu3 %v473_v7 }
 0x297   :  { %449 = vmatmul.f32.vlgmr.msrb.gmra.mxu2 %v814_v59 }
 0x298   :  { %501 = vmatpush.msrb.mxu3 %v471_v9 }
 0x29a   :  { %502 = vmatpush.msrb.mxu3 %v469_v11 }
 0x29c   :  { %503 = vmatpush.msrb.mxu3 %v467_v13 }
 0x29e   :  { %504 = vmatpush.msrb.mxu3 %v465_v15 }
 0x2a0   :  { %505 = vmatpush.msrb.mxu3 %v463_v17 }
 0x2a2   :  { %506 = vmatpush.msrb.mxu3 %v461_v19 }
 0x2a4   :  { %507 = vmatpush.msrb.mxu3 %v459_v21 }
 0x2a6   :  { %508 = vmatpush.msrb.mxu3 %v457_v23 }
 0x2a8   :  { %509 = vmatpush.msrb.mxu3 %v455_v25 }
 0x2fd   :  { %v409_v2 = vpop.xlane.xlu0 %408 }
 0x2fe   :  { %v410_v3 = vadd.f32 %v409_v2, %v253_v1 }
 0x31a   :  { %v450_v28 = vpop.f32.mrf.mxu2 }
 0x31b   :  { %v451_v29 = vadd.f32 %v597_v27, %v450_v28 }
 0x31d   :  { %v453_v30 = vmax.f32 %v451_v29, 0.0 }
 0x31f   :  { %510 = vmatmul.f32.vlgmr.msrb.gmra.mxu3 %v453_v30  ;;  %530 = vmatmul.f32.vlgmr.msra.gmra.mxu0 %v453_v30 }
 0x39c   :  { %v531_v33 = vpop.f32.mrf.mxu0 }
 0x39d   :  { %v532_v34 = vadd.f32 %v531_v33, %v491_v32 }
 0x39f   :  { %v534_v35 = vand.u32 2147483647, %v532_v34  ;;  %v556_v45 = vmin.f32 %v532_v34, 0.0  ;;  %vm539_vm14 = vcmp.ge.f32.partialorder %v532_v34, 0.0 }
 0x3a1   :  { %v535_v36 = vsub.f32 0.0, %v534_v35 }
 0x3a2   :  { %v511_v56 = vpop.f32.mrf.mxu3 }
 0x3a3   :  { %v536_v37 = vmul.f32 1.442695, %v535_v36  ;;  %v512_v60 = vadd.f32 %v511_v56, %v490_v53 }
 0x3a5   :  { %610 = vpow2.f32 %v536_v37 }
 0x3ab   :  { %v611_v39 = vpop.eup %610 }
 0x3ac   :  { %v538_v40 = vadd.f32 1.0, %v611_v39  ;;  %v540_v55 = vsel %vm539_vm14, 1.0, %v611_v39 }
 0x3ae   :  { %612 = vrcp.f32 %v538_v40  ;;  %v552_v44 = vand.u32 2147483648, %v538_v40  ;;  %v550_v50 = vand.u32 2147483647, %v538_v40  ;;  %vm546_vm12 = vweird.f32 %v538_v40 }
 0x3af   :  { %614 = vlog2.f32 %v538_v40 }
 0x3b0   :  { %v553_v52 = vor.u32 1.1754944e-38, %v552_v44  ;;  %vm551_vm15 = vcmp.eq.f32.partialorder %v550_v50, 8.507059e+37 }
 0x3b4   :  { %v613_v41 = vpop.eup %612 }
 0x3b5   :  { %v615_v42 = vpop.eup %614  ;;  %v542_v43 = vmul.f32 %v613_v41, %v538_v40  ;;  %vm547_vm11 = vweird.f32 %v613_v41 }
 0x3b6   :  { %v558_v46 = vmul.f32 0.6931472, %v615_v42  ;;  %vm548_vm13 = vmor %vm546_vm12, %vm547_vm11 }
 0x3b7   :  { %v543_v47 = vsub.f32 1.0, %v542_v43 }
 0x3b8   :  { %v559_v48 = vsub.f32 %v556_v45, %v558_v46 }
 0x3b9   :  { %v544_v49 = vmul.f32 %v613_v41, %v543_v47 }
 0x3ba   :  { %564 = vadd.xlane.f32.xlu1 %v559_v48 }
 0x3bb   :  { %v545_v51 = vadd.f32 %v613_v41, %v544_v49 }
 0x3bd   :  { %v549_v54 = vsel %vm548_vm13, %v613_v41, %v545_v51 }
 0x3be   :  { %v554_v57 = vsel %vm551_vm15, %v553_v52, %v549_v54 }
 0x3bf   :  { %v555_v58 = vmul.f32 %v554_v57, %v540_v55 }
 0x3c1   :  { %v561_v61 = vsub.f32 1.0, %v555_v58  ;;  %v560_v62 = vmul.f32 %v555_v58, %v814_v59 }
 0x3c3   :  { %v562_v63 = vmul.f32 %v561_v61, %v512_v60 }
 0x3c5   :  { %v563_v0 = vadd.f32 %v562_v63, %v560_v62 }
 0x3c7   :  { %568 = vst.msk [vmem:[%s830_s5] sm:$0xff] %vm100_vm0, %v563_v0 }
 0x42d   :  { %v565_v38 = vpop.xlane.xlu1 %564 }
 0x42e   :  { %v566_v4 = vadd.f32 %v565_v38, %v410_v3 }
 0x430   :  { %v567_v5 = vadd.f32 199.62639, %v566_v4 }
 0x432   :  { %570 = vst.msk [vmem:[%s831_s6] sm:$0xff] %vm569_vm1, %v567_v5 }
 0x433   :  { %579 = vsyncpa [#allocation4], 1 }
 0x434   :  { %580 = vsyncpa [#allocation6], 1 }
 0x435   :  { %581 = vsyncpa [#allocation9], 1 }

</bundles_post_ra>
